<compile_context>
chip_gen: v6e
topology: v6e:2x2x1
jax: 0.10.0
libtpu: 0.0.40
codegen_flags: <defaults>
</compile_context>

<pallas_src>
import jax
import jax.numpy as jnp
import numpy as np
from jax import lax
from jax.experimental import pallas as pl
from jax.experimental.pallas import tpu as pltpu


def toy_kernel(x_ref, wc_ref, wl_ref, bl_ref, out_ref, z_ref):
    # x_ref : (N*C, P)  VMEM  input, NCHW with (N,C) collapsed and H*W -> P
    # wc_ref: (O, C)    SMEM  1x1 conv weight (out_ch, in_ch), bias=False
    # wl_ref: (K, O*P)  VMEM  Linear weight, native PyTorch (out_features, in_features)
    # bl_ref: (1, K)    VMEM  Linear bias
    # out_ref: (N, K)   VMEM
    # z_ref : (N, O*P)  VMEM scratch: flattened post-ReLU conv activations
    NC, P = x_ref.shape
    O, C = wc_ref.shape
    N = NC // C

    # Hoist all O*C conv-weight scalars out of the loops (cheap SMEM scalar loads).
    wsc = [[wc_ref[o, c] for c in range(C)] for o in range(O)]

    # ---- 1x1 conv + ReLU on the VPU, written directly in flattened NCHW order ----
    for n in range(N):
        # C contiguous single-row loads for sample n (static sublane offsets, plain vld).
        xn = [x_ref[pl.ds(n * C + c, 1), :] for c in range(C)]      # each (1, P)
        for o in range(O):
            seg = wsc[o][0] * xn[0]
            for c in range(1, C):
                seg = seg + wsc[o][c] * xn[c]
            # z[n, o*P:(o+1)*P]: lane offset is a multiple of 128 -> full-width store.
            z_ref[pl.ds(n, 1), pl.ds(o * P, P)] = jnp.maximum(seg, 0.0)

    # ---- Linear: ONE (N, O*P) . (K, O*P)^T dot on the MXU, + bias ----
    out = lax.dot_general(
        z_ref[...], wl_ref[...],
        dimension_numbers=(((1,), (1,)), ((), ())),                  # z @ w_lin^T
        preferred_element_type=jnp.float32,
    )                                                                # (N, K)
    out_ref[...] = out + bl_ref[...]


def toy_network_forward(x, w_conv, w_lin, b_lin):
    """x: (N, C, H, W) f32; w_conv: (O, C); w_lin: (K, O*H*W); b_lin: (K,)."""
    N, C, H, W = x.shape
    P = H * W
    O = w_conv.shape[0]
    K = w_lin.shape[0]

    x2 = x.reshape(N * C, P)      # free row-major collapse -> one dense (8,128)-tile row group
    bl2 = b_lin.reshape(1, K)     # w_lin passed completely untouched (native layout)

    return pl.pallas_call(
        toy_kernel,
        out_shape=jax.ShapeDtypeStruct((N, K), jnp.float32),
        in_specs=[
            pl.BlockSpec(memory_space=pltpu.MemorySpace.VMEM),    # x (N*C, P)
            pl.BlockSpec(memory_space=pltpu.MemorySpace.SMEM),    # conv weight scalars (O, C)
            pl.BlockSpec(memory_space=pltpu.MemorySpace.VMEM),    # linear weight (K, O*P)
            pl.BlockSpec(memory_space=pltpu.MemorySpace.VMEM),    # linear bias (1, K)
        ],
        out_specs=pl.BlockSpec(memory_space=pltpu.MemorySpace.VMEM),
        scratch_shapes=[pltpu.VMEM((N, O * P), jnp.float32)],
    )(x2, w_conv, w_lin, bl2)


def reference_forward(x, w_conv, w_lin, b_lin):
    """Pure-JAX reference matching the PyTorch module semantics."""
    N = x.shape[0]
    y = jnp.einsum("oc,nchw->nohw", w_conv, x)        # 1x1 conv, no bias
    y = jnp.maximum(y, 0.0)                           # ReLU
    y = y.reshape(N, -1)                              # NCHW flatten
    return y @ w_lin.T + b_lin                        # Linear


if __name__ == "__main__":
    # ToyNetwork(input_shape=(4, 16, 16), n_classes=10), batch=2
    batch, C, H, W = 2, 4, 16, 16
    n_classes = 10
    out_ch = 8
    in_features = H * W * out_ch

    key = jax.random.PRNGKey(0)
    kx, kc, kw, kb = jax.random.split(key, 4)
    x = jax.random.normal(kx, (batch, C, H, W), dtype=jnp.float32)
    w_conv = 0.1 * jax.random.normal(kc, (out_ch, C), dtype=jnp.float32)            # Conv2d 1x1, bias=False
    w_lin = 0.05 * jax.random.normal(kw, (n_classes, in_features), dtype=jnp.float32)
    b_lin = 0.05 * jax.random.normal(kb, (n_classes,), dtype=jnp.float32)

    out = toy_network_forward(x, w_conv, w_lin, b_lin)
    out = jax.block_until_ready(out)

    ref = reference_forward(x, w_conv, w_lin, b_lin)
    np.testing.assert_allclose(np.asarray(out), np.asarray(ref), rtol=1e-5, atol=1e-5)

    print("KERNEL_OK")
</pallas_src>

<mosaic_0001>
module attributes {stable_mosaic.version = 11 : i64} {
  func.func @toy_kernel(%arg0: memref<8x256xf32, #tpu.memory_space<vmem>>, %arg1: memref<8x4xf32, #tpu.memory_space<smem>>, %arg2: memref<10x2048xf32, #tpu.memory_space<vmem>>, %arg3: memref<1x10xf32, #tpu.memory_space<vmem>>, %arg4: memref<2x10xf32, #tpu.memory_space<vmem>>, %arg5: memref<2x2048xf32, #tpu.memory_space<vmem>>) attributes {dimension_semantics = [], scalar_prefetch = 0 : i64, scratch_operands = 1 : i64, tpu.core_type = #tpu.core_type<tc>} {
    %c0 = arith.constant 0 : index
    %c0_0 = arith.constant 0 : index
    %0 = memref.load %arg1[%c0, %c0_0] : memref<8x4xf32, #tpu.memory_space<smem>>
    %c0_1 = arith.constant 0 : index
    %c1 = arith.constant 1 : index
    %1 = memref.load %arg1[%c0_1, %c1] : memref<8x4xf32, #tpu.memory_space<smem>>
    %c0_2 = arith.constant 0 : index
    %c2 = arith.constant 2 : index
    %2 = memref.load %arg1[%c0_2, %c2] : memref<8x4xf32, #tpu.memory_space<smem>>
    %c0_3 = arith.constant 0 : index
    %c3 = arith.constant 3 : index
    %3 = memref.load %arg1[%c0_3, %c3] : memref<8x4xf32, #tpu.memory_space<smem>>
    %c1_4 = arith.constant 1 : index
    %c0_5 = arith.constant 0 : index
    %4 = memref.load %arg1[%c1_4, %c0_5] : memref<8x4xf32, #tpu.memory_space<smem>>
    %c1_6 = arith.constant 1 : index
    %c1_7 = arith.constant 1 : index
    %5 = memref.load %arg1[%c1_6, %c1_7] : memref<8x4xf32, #tpu.memory_space<smem>>
    %c1_8 = arith.constant 1 : index
    %c2_9 = arith.constant 2 : index
    %6 = memref.load %arg1[%c1_8, %c2_9] : memref<8x4xf32, #tpu.memory_space<smem>>
    %c1_10 = arith.constant 1 : index
    %c3_11 = arith.constant 3 : index
    %7 = memref.load %arg1[%c1_10, %c3_11] : memref<8x4xf32, #tpu.memory_space<smem>>
    %c2_12 = arith.constant 2 : index
    %c0_13 = arith.constant 0 : index
    %8 = memref.load %arg1[%c2_12, %c0_13] : memref<8x4xf32, #tpu.memory_space<smem>>
    %c2_14 = arith.constant 2 : index
    %c1_15 = arith.constant 1 : index
    %9 = memref.load %arg1[%c2_14, %c1_15] : memref<8x4xf32, #tpu.memory_space<smem>>
    %c2_16 = arith.constant 2 : index
    %c2_17 = arith.constant 2 : index
    %10 = memref.load %arg1[%c2_16, %c2_17] : memref<8x4xf32, #tpu.memory_space<smem>>
    %c2_18 = arith.constant 2 : index
    %c3_19 = arith.constant 3 : index
    %11 = memref.load %arg1[%c2_18, %c3_19] : memref<8x4xf32, #tpu.memory_space<smem>>
    %c3_20 = arith.constant 3 : index
    %c0_21 = arith.constant 0 : index
    %12 = memref.load %arg1[%c3_20, %c0_21] : memref<8x4xf32, #tpu.memory_space<smem>>
    %c3_22 = arith.constant 3 : index
    %c1_23 = arith.constant 1 : index
    %13 = memref.load %arg1[%c3_22, %c1_23] : memref<8x4xf32, #tpu.memory_space<smem>>
    %c3_24 = arith.constant 3 : index
    %c2_25 = arith.constant 2 : index
    %14 = memref.load %arg1[%c3_24, %c2_25] : memref<8x4xf32, #tpu.memory_space<smem>>
    %c3_26 = arith.constant 3 : index
    %c3_27 = arith.constant 3 : index
    %15 = memref.load %arg1[%c3_26, %c3_27] : memref<8x4xf32, #tpu.memory_space<smem>>
    %c4 = arith.constant 4 : index
    %c0_28 = arith.constant 0 : index
    %16 = memref.load %arg1[%c4, %c0_28] : memref<8x4xf32, #tpu.memory_space<smem>>
    %c4_29 = arith.constant 4 : index
    %c1_30 = arith.constant 1 : index
    %17 = memref.load %arg1[%c4_29, %c1_30] : memref<8x4xf32, #tpu.memory_space<smem>>
    %c4_31 = arith.constant 4 : index
    %c2_32 = arith.constant 2 : index
    %18 = memref.load %arg1[%c4_31, %c2_32] : memref<8x4xf32, #tpu.memory_space<smem>>
    %c4_33 = arith.constant 4 : index
    %c3_34 = arith.constant 3 : index
    %19 = memref.load %arg1[%c4_33, %c3_34] : memref<8x4xf32, #tpu.memory_space<smem>>
    %c5 = arith.constant 5 : index
    %c0_35 = arith.constant 0 : index
    %20 = memref.load %arg1[%c5, %c0_35] : memref<8x4xf32, #tpu.memory_space<smem>>
    %c5_36 = arith.constant 5 : index
    %c1_37 = arith.constant 1 : index
    %21 = memref.load %arg1[%c5_36, %c1_37] : memref<8x4xf32, #tpu.memory_space<smem>>
    %c5_38 = arith.constant 5 : index
    %c2_39 = arith.constant 2 : index
    %22 = memref.load %arg1[%c5_38, %c2_39] : memref<8x4xf32, #tpu.memory_space<smem>>
    %c5_40 = arith.constant 5 : index
    %c3_41 = arith.constant 3 : index
    %23 = memref.load %arg1[%c5_40, %c3_41] : memref<8x4xf32, #tpu.memory_space<smem>>
    %c6 = arith.constant 6 : index
    %c0_42 = arith.constant 0 : index
    %24 = memref.load %arg1[%c6, %c0_42] : memref<8x4xf32, #tpu.memory_space<smem>>
    %c6_43 = arith.constant 6 : index
    %c1_44 = arith.constant 1 : index
    %25 = memref.load %arg1[%c6_43, %c1_44] : memref<8x4xf32, #tpu.memory_space<smem>>
    %c6_45 = arith.constant 6 : index
    %c2_46 = arith.constant 2 : index
    %26 = memref.load %arg1[%c6_45, %c2_46] : memref<8x4xf32, #tpu.memory_space<smem>>
    %c6_47 = arith.constant 6 : index
    %c3_48 = arith.constant 3 : index
    %27 = memref.load %arg1[%c6_47, %c3_48] : memref<8x4xf32, #tpu.memory_space<smem>>
    %c7 = arith.constant 7 : index
    %c0_49 = arith.constant 0 : index
    %28 = memref.load %arg1[%c7, %c0_49] : memref<8x4xf32, #tpu.memory_space<smem>>
    %c7_50 = arith.constant 7 : index
    %c1_51 = arith.constant 1 : index
    %29 = memref.load %arg1[%c7_50, %c1_51] : memref<8x4xf32, #tpu.memory_space<smem>>
    %c7_52 = arith.constant 7 : index
    %c2_53 = arith.constant 2 : index
    %30 = memref.load %arg1[%c7_52, %c2_53] : memref<8x4xf32, #tpu.memory_space<smem>>
    %c7_54 = arith.constant 7 : index
    %c3_55 = arith.constant 3 : index
    %31 = memref.load %arg1[%c7_54, %c3_55] : memref<8x4xf32, #tpu.memory_space<smem>>
    %c0_56 = arith.constant 0 : index
    %c0_57 = arith.constant 0 : index
    %32 = vector.load %arg0[%c0_56, %c0_57] : memref<8x256xf32, #tpu.memory_space<vmem>>, vector<1x256xf32>
    %c1_58 = arith.constant 1 : index
    %c0_59 = arith.constant 0 : index
    %33 = vector.load %arg0[%c1_58, %c0_59] : memref<8x256xf32, #tpu.memory_space<vmem>>, vector<1x256xf32>
    %c2_60 = arith.constant 2 : index
    %c0_61 = arith.constant 0 : index
    %34 = vector.load %arg0[%c2_60, %c0_61] : memref<8x256xf32, #tpu.memory_space<vmem>>, vector<1x256xf32>
    %c3_62 = arith.constant 3 : index
    %c0_63 = arith.constant 0 : index
    %35 = vector.load %arg0[%c3_62, %c0_63] : memref<8x256xf32, #tpu.memory_space<vmem>>, vector<1x256xf32>
    %36 = vector.broadcast %0 : f32 to vector<1x256xf32>
    %37 = arith.mulf %36, %32 : vector<1x256xf32>
    %38 = vector.broadcast %1 : f32 to vector<1x256xf32>
    %39 = arith.mulf %38, %33 : vector<1x256xf32>
    %40 = arith.addf %37, %39 : vector<1x256xf32>
    %41 = vector.broadcast %2 : f32 to vector<1x256xf32>
    %42 = arith.mulf %41, %34 : vector<1x256xf32>
    %43 = arith.addf %40, %42 : vector<1x256xf32>
    %44 = vector.broadcast %3 : f32 to vector<1x256xf32>
    %45 = arith.mulf %44, %35 : vector<1x256xf32>
    %46 = arith.addf %43, %45 : vector<1x256xf32>
    %cst = arith.constant 0.000000e+00 : f32
    %47 = vector.broadcast %cst : f32 to vector<1x256xf32>
    %48 = arith.maximumf %46, %47 : vector<1x256xf32>
    %c0_64 = arith.constant 0 : index
    %c0_65 = arith.constant 0 : index
    %49 = vector.load %arg5[%c0_64, %c0_65] : memref<2x2048xf32, #tpu.memory_space<vmem>>, vector<1x256xf32>
    tpu.vector_store %arg5[%c0_64, %c0_65], %48 {strides = array<i32>} : memref<2x2048xf32, #tpu.memory_space<vmem>>, vector<1x256xf32>,
    %50 = vector.broadcast %4 : f32 to vector<1x256xf32>
    %51 = arith.mulf %50, %32 : vector<1x256xf32>
    %52 = vector.broadcast %5 : f32 to vector<1x256xf32>
    %53 = arith.mulf %52, %33 : vector<1x256xf32>
    %54 = arith.addf %51, %53 : vector<1x256xf32>
    %55 = vector.broadcast %6 : f32 to vector<1x256xf32>
    %56 = arith.mulf %55, %34 : vector<1x256xf32>
    %57 = arith.addf %54, %56 : vector<1x256xf32>
    %58 = vector.broadcast %7 : f32 to vector<1x256xf32>
    %59 = arith.mulf %58, %35 : vector<1x256xf32>
    %60 = arith.addf %57, %59 : vector<1x256xf32>
    %cst_66 = arith.constant 0.000000e+00 : f32
    %61 = vector.broadcast %cst_66 : f32 to vector<1x256xf32>
    %62 = arith.maximumf %60, %61 : vector<1x256xf32>
    %c0_67 = arith.constant 0 : index
    %c256 = arith.constant 256 : index
    %63 = vector.load %arg5[%c0_67, %c256] : memref<2x2048xf32, #tpu.memory_space<vmem>>, vector<1x256xf32>
    tpu.vector_store %arg5[%c0_67, %c256], %62 {strides = array<i32>} : memref<2x2048xf32, #tpu.memory_space<vmem>>, vector<1x256xf32>,
    %64 = vector.broadcast %8 : f32 to vector<1x256xf32>
    %65 = arith.mulf %64, %32 : vector<1x256xf32>
    %66 = vector.broadcast %9 : f32 to vector<1x256xf32>
    %67 = arith.mulf %66, %33 : vector<1x256xf32>
    %68 = arith.addf %65, %67 : vector<1x256xf32>
    %69 = vector.broadcast %10 : f32 to vector<1x256xf32>
    %70 = arith.mulf %69, %34 : vector<1x256xf32>
    %71 = arith.addf %68, %70 : vector<1x256xf32>
    %72 = vector.broadcast %11 : f32 to vector<1x256xf32>
    %73 = arith.mulf %72, %35 : vector<1x256xf32>
    %74 = arith.addf %71, %73 : vector<1x256xf32>
    %cst_68 = arith.constant 0.000000e+00 : f32
    %75 = vector.broadcast %cst_68 : f32 to vector<1x256xf32>
    %76 = arith.maximumf %74, %75 : vector<1x256xf32>
    %c0_69 = arith.constant 0 : index
    %c512 = arith.constant 512 : index
    %77 = vector.load %arg5[%c0_69, %c512] : memref<2x2048xf32, #tpu.memory_space<vmem>>, vector<1x256xf32>
    tpu.vector_store %arg5[%c0_69, %c512], %76 {strides = array<i32>} : memref<2x2048xf32, #tpu.memory_space<vmem>>, vector<1x256xf32>,
    %78 = vector.broadcast %12 : f32 to vector<1x256xf32>
    %79 = arith.mulf %78, %32 : vector<1x256xf32>
    %80 = vector.broadcast %13 : f32 to vector<1x256xf32>
    %81 = arith.mulf %80, %33 : vector<1x256xf32>
    %82 = arith.addf %79, %81 : vector<1x256xf32>
    %83 = vector.broadcast %14 : f32 to vector<1x256xf32>
    %84 = arith.mulf %83, %34 : vector<1x256xf32>
    %85 = arith.addf %82, %84 : vector<1x256xf32>
    %86 = vector.broadcast %15 : f32 to vector<1x256xf32>
    %87 = arith.mulf %86, %35 : vector<1x256xf32>
    %88 = arith.addf %85, %87 : vector<1x256xf32>
    %cst_70 = arith.constant 0.000000e+00 : f32
    %89 = vector.broadcast %cst_70 : f32 to vector<1x256xf32>
    %90 = arith.maximumf %88, %89 : vector<1x256xf32>
    %c0_71 = arith.constant 0 : index
    %c768 = arith.constant 768 : index
    %91 = vector.load %arg5[%c0_71, %c768] : memref<2x2048xf32, #tpu.memory_space<vmem>>, vector<1x256xf32>
    tpu.vector_store %arg5[%c0_71, %c768], %90 {strides = array<i32>} : memref<2x2048xf32, #tpu.memory_space<vmem>>, vector<1x256xf32>,
    %92 = vector.broadcast %16 : f32 to vector<1x256xf32>
    %93 = arith.mulf %92, %32 : vector<1x256xf32>
    %94 = vector.broadcast %17 : f32 to vector<1x256xf32>
    %95 = arith.mulf %94, %33 : vector<1x256xf32>
    %96 = arith.addf %93, %95 : vector<1x256xf32>
    %97 = vector.broadcast %18 : f32 to vector<1x256xf32>
    %98 = arith.mulf %97, %34 : vector<1x256xf32>
    %99 = arith.addf %96, %98 : vector<1x256xf32>
    %100 = vector.broadcast %19 : f32 to vector<1x256xf32>
    %101 = arith.mulf %100, %35 : vector<1x256xf32>
    %102 = arith.addf %99, %101 : vector<1x256xf32>
    %cst_72 = arith.constant 0.000000e+00 : f32
    %103 = vector.broadcast %cst_72 : f32 to vector<1x256xf32>
    %104 = arith.maximumf %102, %103 : vector<1x256xf32>
    %c0_73 = arith.constant 0 : index
    %c1024 = arith.constant 1024 : index
    %105 = vector.load %arg5[%c0_73, %c1024] : memref<2x2048xf32, #tpu.memory_space<vmem>>, vector<1x256xf32>
    tpu.vector_store %arg5[%c0_73, %c1024], %104 {strides = array<i32>} : memref<2x2048xf32, #tpu.memory_space<vmem>>, vector<1x256xf32>,
    %106 = vector.broadcast %20 : f32 to vector<1x256xf32>
    %107 = arith.mulf %106, %32 : vector<1x256xf32>
    %108 = vector.broadcast %21 : f32 to vector<1x256xf32>
    %109 = arith.mulf %108, %33 : vector<1x256xf32>
    %110 = arith.addf %107, %109 : vector<1x256xf32>
    %111 = vector.broadcast %22 : f32 to vector<1x256xf32>
    %112 = arith.mulf %111, %34 : vector<1x256xf32>
    %113 = arith.addf %110, %112 : vector<1x256xf32>
    %114 = vector.broadcast %23 : f32 to vector<1x256xf32>
    %115 = arith.mulf %114, %35 : vector<1x256xf32>
    %116 = arith.addf %113, %115 : vector<1x256xf32>
    %cst_74 = arith.constant 0.000000e+00 : f32
    %117 = vector.broadcast %cst_74 : f32 to vector<1x256xf32>
    %118 = arith.maximumf %116, %117 : vector<1x256xf32>
    %c0_75 = arith.constant 0 : index
    %c1280 = arith.constant 1280 : index
    %119 = vector.load %arg5[%c0_75, %c1280] : memref<2x2048xf32, #tpu.memory_space<vmem>>, vector<1x256xf32>
    tpu.vector_store %arg5[%c0_75, %c1280], %118 {strides = array<i32>} : memref<2x2048xf32, #tpu.memory_space<vmem>>, vector<1x256xf32>,
    %120 = vector.broadcast %24 : f32 to vector<1x256xf32>
    %121 = arith.mulf %120, %32 : vector<1x256xf32>
    %122 = vector.broadcast %25 : f32 to vector<1x256xf32>
    %123 = arith.mulf %122, %33 : vector<1x256xf32>
    %124 = arith.addf %121, %123 : vector<1x256xf32>
    %125 = vector.broadcast %26 : f32 to vector<1x256xf32>
    %126 = arith.mulf %125, %34 : vector<1x256xf32>
    %127 = arith.addf %124, %126 : vector<1x256xf32>
    %128 = vector.broadcast %27 : f32 to vector<1x256xf32>
    %129 = arith.mulf %128, %35 : vector<1x256xf32>
    %130 = arith.addf %127, %129 : vector<1x256xf32>
    %cst_76 = arith.constant 0.000000e+00 : f32
    %131 = vector.broadcast %cst_76 : f32 to vector<1x256xf32>
    %132 = arith.maximumf %130, %131 : vector<1x256xf32>
    %c0_77 = arith.constant 0 : index
    %c1536 = arith.constant 1536 : index
    %133 = vector.load %arg5[%c0_77, %c1536] : memref<2x2048xf32, #tpu.memory_space<vmem>>, vector<1x256xf32>
    tpu.vector_store %arg5[%c0_77, %c1536], %132 {strides = array<i32>} : memref<2x2048xf32, #tpu.memory_space<vmem>>, vector<1x256xf32>,
    %134 = vector.broadcast %28 : f32 to vector<1x256xf32>
    %135 = arith.mulf %134, %32 : vector<1x256xf32>
    %136 = vector.broadcast %29 : f32 to vector<1x256xf32>
    %137 = arith.mulf %136, %33 : vector<1x256xf32>
    %138 = arith.addf %135, %137 : vector<1x256xf32>
    %139 = vector.broadcast %30 : f32 to vector<1x256xf32>
    %140 = arith.mulf %139, %34 : vector<1x256xf32>
    %141 = arith.addf %138, %140 : vector<1x256xf32>
    %142 = vector.broadcast %31 : f32 to vector<1x256xf32>
    %143 = arith.mulf %142, %35 : vector<1x256xf32>
    %144 = arith.addf %141, %143 : vector<1x256xf32>
    %cst_78 = arith.constant 0.000000e+00 : f32
    %145 = vector.broadcast %cst_78 : f32 to vector<1x256xf32>
    %146 = arith.maximumf %144, %145 : vector<1x256xf32>
    %c0_79 = arith.constant 0 : index
    %c1792 = arith.constant 1792 : index
    %147 = vector.load %arg5[%c0_79, %c1792] : memref<2x2048xf32, #tpu.memory_space<vmem>>, vector<1x256xf32>
    tpu.vector_store %arg5[%c0_79, %c1792], %146 {strides = array<i32>} : memref<2x2048xf32, #tpu.memory_space<vmem>>, vector<1x256xf32>,
    %c4_80 = arith.constant 4 : index
    %c0_81 = arith.constant 0 : index
    %148 = vector.load %arg0[%c4_80, %c0_81] : memref<8x256xf32, #tpu.memory_space<vmem>>, vector<1x256xf32>
    %c5_82 = arith.constant 5 : index
    %c0_83 = arith.constant 0 : index
    %149 = vector.load %arg0[%c5_82, %c0_83] : memref<8x256xf32, #tpu.memory_space<vmem>>, vector<1x256xf32>
    %c6_84 = arith.constant 6 : index
    %c0_85 = arith.constant 0 : index
    %150 = vector.load %arg0[%c6_84, %c0_85] : memref<8x256xf32, #tpu.memory_space<vmem>>, vector<1x256xf32>
    %c7_86 = arith.constant 7 : index
    %c0_87 = arith.constant 0 : index
    %151 = vector.load %arg0[%c7_86, %c0_87] : memref<8x256xf32, #tpu.memory_space<vmem>>, vector<1x256xf32>
    %152 = vector.broadcast %0 : f32 to vector<1x256xf32>
    %153 = arith.mulf %152, %148 : vector<1x256xf32>
    %154 = vector.broadcast %1 : f32 to vector<1x256xf32>
    %155 = arith.mulf %154, %149 : vector<1x256xf32>
    %156 = arith.addf %153, %155 : vector<1x256xf32>
    %157 = vector.broadcast %2 : f32 to vector<1x256xf32>
    %158 = arith.mulf %157, %150 : vector<1x256xf32>
    %159 = arith.addf %156, %158 : vector<1x256xf32>
    %160 = vector.broadcast %3 : f32 to vector<1x256xf32>
    %161 = arith.mulf %160, %151 : vector<1x256xf32>
    %162 = arith.addf %159, %161 : vector<1x256xf32>
    %cst_88 = arith.constant 0.000000e+00 : f32
    %163 = vector.broadcast %cst_88 : f32 to vector<1x256xf32>
    %164 = arith.maximumf %162, %163 : vector<1x256xf32>
    %c1_89 = arith.constant 1 : index
    %c0_90 = arith.constant 0 : index
    %165 = vector.load %arg5[%c1_89, %c0_90] : memref<2x2048xf32, #tpu.memory_space<vmem>>, vector<1x256xf32>
    tpu.vector_store %arg5[%c1_89, %c0_90], %164 {strides = array<i32>} : memref<2x2048xf32, #tpu.memory_space<vmem>>, vector<1x256xf32>,
    %166 = vector.broadcast %4 : f32 to vector<1x256xf32>
    %167 = arith.mulf %166, %148 : vector<1x256xf32>
    %168 = vector.broadcast %5 : f32 to vector<1x256xf32>
    %169 = arith.mulf %168, %149 : vector<1x256xf32>
    %170 = arith.addf %167, %169 : vector<1x256xf32>
    %171 = vector.broadcast %6 : f32 to vector<1x256xf32>
    %172 = arith.mulf %171, %150 : vector<1x256xf32>
    %173 = arith.addf %170, %172 : vector<1x256xf32>
    %174 = vector.broadcast %7 : f32 to vector<1x256xf32>
    %175 = arith.mulf %174, %151 : vector<1x256xf32>
    %176 = arith.addf %173, %175 : vector<1x256xf32>
    %cst_91 = arith.constant 0.000000e+00 : f32
    %177 = vector.broadcast %cst_91 : f32 to vector<1x256xf32>
    %178 = arith.maximumf %176, %177 : vector<1x256xf32>
    %c1_92 = arith.constant 1 : index
    %c256_93 = arith.constant 256 : index
    %179 = vector.load %arg5[%c1_92, %c256_93] : memref<2x2048xf32, #tpu.memory_space<vmem>>, vector<1x256xf32>
    tpu.vector_store %arg5[%c1_92, %c256_93], %178 {strides = array<i32>} : memref<2x2048xf32, #tpu.memory_space<vmem>>, vector<1x256xf32>,
    %180 = vector.broadcast %8 : f32 to vector<1x256xf32>
    %181 = arith.mulf %180, %148 : vector<1x256xf32>
    %182 = vector.broadcast %9 : f32 to vector<1x256xf32>
    %183 = arith.mulf %182, %149 : vector<1x256xf32>
    %184 = arith.addf %181, %183 : vector<1x256xf32>
    %185 = vector.broadcast %10 : f32 to vector<1x256xf32>
    %186 = arith.mulf %185, %150 : vector<1x256xf32>
    %187 = arith.addf %184, %186 : vector<1x256xf32>
    %188 = vector.broadcast %11 : f32 to vector<1x256xf32>
    %189 = arith.mulf %188, %151 : vector<1x256xf32>
    %190 = arith.addf %187, %189 : vector<1x256xf32>
    %cst_94 = arith.constant 0.000000e+00 : f32
    %191 = vector.broadcast %cst_94 : f32 to vector<1x256xf32>
    %192 = arith.maximumf %190, %191 : vector<1x256xf32>
    %c1_95 = arith.constant 1 : index
    %c512_96 = arith.constant 512 : index
    %193 = vector.load %arg5[%c1_95, %c512_96] : memref<2x2048xf32, #tpu.memory_space<vmem>>, vector<1x256xf32>
    tpu.vector_store %arg5[%c1_95, %c512_96], %192 {strides = array<i32>} : memref<2x2048xf32, #tpu.memory_space<vmem>>, vector<1x256xf32>,
    %194 = vector.broadcast %12 : f32 to vector<1x256xf32>
    %195 = arith.mulf %194, %148 : vector<1x256xf32>
    %196 = vector.broadcast %13 : f32 to vector<1x256xf32>
    %197 = arith.mulf %196, %149 : vector<1x256xf32>
    %198 = arith.addf %195, %197 : vector<1x256xf32>
    %199 = vector.broadcast %14 : f32 to vector<1x256xf32>
    %200 = arith.mulf %199, %150 : vector<1x256xf32>
    %201 = arith.addf %198, %200 : vector<1x256xf32>
    %202 = vector.broadcast %15 : f32 to vector<1x256xf32>
    %203 = arith.mulf %202, %151 : vector<1x256xf32>
    %204 = arith.addf %201, %203 : vector<1x256xf32>
    %cst_97 = arith.constant 0.000000e+00 : f32
    %205 = vector.broadcast %cst_97 : f32 to vector<1x256xf32>
    %206 = arith.maximumf %204, %205 : vector<1x256xf32>
    %c1_98 = arith.constant 1 : index
    %c768_99 = arith.constant 768 : index
    %207 = vector.load %arg5[%c1_98, %c768_99] : memref<2x2048xf32, #tpu.memory_space<vmem>>, vector<1x256xf32>
    tpu.vector_store %arg5[%c1_98, %c768_99], %206 {strides = array<i32>} : memref<2x2048xf32, #tpu.memory_space<vmem>>, vector<1x256xf32>,
    %208 = vector.broadcast %16 : f32 to vector<1x256xf32>
    %209 = arith.mulf %208, %148 : vector<1x256xf32>
    %210 = vector.broadcast %17 : f32 to vector<1x256xf32>
    %211 = arith.mulf %210, %149 : vector<1x256xf32>
    %212 = arith.addf %209, %211 : vector<1x256xf32>
    %213 = vector.broadcast %18 : f32 to vector<1x256xf32>
    %214 = arith.mulf %213, %150 : vector<1x256xf32>
    %215 = arith.addf %212, %214 : vector<1x256xf32>
    %216 = vector.broadcast %19 : f32 to vector<1x256xf32>
    %217 = arith.mulf %216, %151 : vector<1x256xf32>
    %218 = arith.addf %215, %217 : vector<1x256xf32>
    %cst_100 = arith.constant 0.000000e+00 : f32
    %219 = vector.broadcast %cst_100 : f32 to vector<1x256xf32>
    %220 = arith.maximumf %218, %219 : vector<1x256xf32>
    %c1_101 = arith.constant 1 : index
    %c1024_102 = arith.constant 1024 : index
    %221 = vector.load %arg5[%c1_101, %c1024_102] : memref<2x2048xf32, #tpu.memory_space<vmem>>, vector<1x256xf32>
    tpu.vector_store %arg5[%c1_101, %c1024_102], %220 {strides = array<i32>} : memref<2x2048xf32, #tpu.memory_space<vmem>>, vector<1x256xf32>,
    %222 = vector.broadcast %20 : f32 to vector<1x256xf32>
    %223 = arith.mulf %222, %148 : vector<1x256xf32>
    %224 = vector.broadcast %21 : f32 to vector<1x256xf32>
    %225 = arith.mulf %224, %149 : vector<1x256xf32>
    %226 = arith.addf %223, %225 : vector<1x256xf32>
    %227 = vector.broadcast %22 : f32 to vector<1x256xf32>
    %228 = arith.mulf %227, %150 : vector<1x256xf32>
    %229 = arith.addf %226, %228 : vector<1x256xf32>
    %230 = vector.broadcast %23 : f32 to vector<1x256xf32>
    %231 = arith.mulf %230, %151 : vector<1x256xf32>
    %232 = arith.addf %229, %231 : vector<1x256xf32>
    %cst_103 = arith.constant 0.000000e+00 : f32
    %233 = vector.broadcast %cst_103 : f32 to vector<1x256xf32>
    %234 = arith.maximumf %232, %233 : vector<1x256xf32>
    %c1_104 = arith.constant 1 : index
    %c1280_105 = arith.constant 1280 : index
    %235 = vector.load %arg5[%c1_104, %c1280_105] : memref<2x2048xf32, #tpu.memory_space<vmem>>, vector<1x256xf32>
    tpu.vector_store %arg5[%c1_104, %c1280_105], %234 {strides = array<i32>} : memref<2x2048xf32, #tpu.memory_space<vmem>>, vector<1x256xf32>,
    %236 = vector.broadcast %24 : f32 to vector<1x256xf32>
    %237 = arith.mulf %236, %148 : vector<1x256xf32>
    %238 = vector.broadcast %25 : f32 to vector<1x256xf32>
    %239 = arith.mulf %238, %149 : vector<1x256xf32>
    %240 = arith.addf %237, %239 : vector<1x256xf32>
    %241 = vector.broadcast %26 : f32 to vector<1x256xf32>
    %242 = arith.mulf %241, %150 : vector<1x256xf32>
    %243 = arith.addf %240, %242 : vector<1x256xf32>
    %244 = vector.broadcast %27 : f32 to vector<1x256xf32>
    %245 = arith.mulf %244, %151 : vector<1x256xf32>
    %246 = arith.addf %243, %245 : vector<1x256xf32>
    %cst_106 = arith.constant 0.000000e+00 : f32
    %247 = vector.broadcast %cst_106 : f32 to vector<1x256xf32>
    %248 = arith.maximumf %246, %247 : vector<1x256xf32>
    %c1_107 = arith.constant 1 : index
    %c1536_108 = arith.constant 1536 : index
    %249 = vector.load %arg5[%c1_107, %c1536_108] : memref<2x2048xf32, #tpu.memory_space<vmem>>, vector<1x256xf32>
    tpu.vector_store %arg5[%c1_107, %c1536_108], %248 {strides = array<i32>} : memref<2x2048xf32, #tpu.memory_space<vmem>>, vector<1x256xf32>,
    %250 = vector.broadcast %28 : f32 to vector<1x256xf32>
    %251 = arith.mulf %250, %148 : vector<1x256xf32>
    %252 = vector.broadcast %29 : f32 to vector<1x256xf32>
    %253 = arith.mulf %252, %149 : vector<1x256xf32>
    %254 = arith.addf %251, %253 : vector<1x256xf32>
    %255 = vector.broadcast %30 : f32 to vector<1x256xf32>
    %256 = arith.mulf %255, %150 : vector<1x256xf32>
    %257 = arith.addf %254, %256 : vector<1x256xf32>
    %258 = vector.broadcast %31 : f32 to vector<1x256xf32>
    %259 = arith.mulf %258, %151 : vector<1x256xf32>
    %260 = arith.addf %257, %259 : vector<1x256xf32>
    %cst_109 = arith.constant 0.000000e+00 : f32
    %261 = vector.broadcast %cst_109 : f32 to vector<1x256xf32>
    %262 = arith.maximumf %260, %261 : vector<1x256xf32>
    %c1_110 = arith.constant 1 : index
    %c1792_111 = arith.constant 1792 : index
    %263 = vector.load %arg5[%c1_110, %c1792_111] : memref<2x2048xf32, #tpu.memory_space<vmem>>, vector<1x256xf32>
    tpu.vector_store %arg5[%c1_110, %c1792_111], %262 {strides = array<i32>} : memref<2x2048xf32, #tpu.memory_space<vmem>>, vector<1x256xf32>,
    %c0_112 = arith.constant 0 : index
    %c0_113 = arith.constant 0 : index
    %264 = vector.load %arg5[%c0_112, %c0_113] : memref<2x2048xf32, #tpu.memory_space<vmem>>, vector<2x2048xf32>
    %c0_114 = arith.constant 0 : index
    %c0_115 = arith.constant 0 : index
    %265 = vector.load %arg2[%c0_114, %c0_115] : memref<10x2048xf32, #tpu.memory_space<vmem>>, vector<10x2048xf32>
    %cst_116 = arith.constant dense<0.000000e+00> : vector<2x10xf32>
    %266 = tpu.matmul %264, %265, %cst_116 {dimension_numbers = #tpu.dot_dimension_numbers<[1], [1], [0], [0], [0, 0, 1, 0], [], []>} : vector<2x2048xf32>, vector<10x2048xf32>, vector<2x10xf32> -> vector<2x10xf32>
    %c0_117 = arith.constant 0 : index
    %c0_118 = arith.constant 0 : index
    %267 = vector.load %arg3[%c0_117, %c0_118] : memref<1x10xf32, #tpu.memory_space<vmem>>, vector<1x10xf32>
    %268 = vector.broadcast %267 : vector<1x10xf32> to vector<2x10xf32>
    %269 = arith.addf %266, %268 : vector<2x10xf32>
    %c0_119 = arith.constant 0 : index
    %c0_120 = arith.constant 0 : index
    %270 = vector.load %arg4[%c0_119, %c0_120] : memref<2x10xf32, #tpu.memory_space<vmem>>, vector<2x10xf32>
    tpu.vector_store %arg4[%c0_119, %c0_120], %269 {strides = array<i32>} : memref<2x10xf32, #tpu.memory_space<vmem>>, vector<2x10xf32>,
    return
  }
}

</mosaic_0001>

<bundles_post_ra>
// kernel: tpu_custom_call.1
= control target key start
LH: loop header
LB: loop body
LE: loop exit
PB: predicated region body
PF: predicated region fallthrough
CT: control target
= control target key end

     0   :  { %9 = vsyncpa [#allocation4], 0  ;;  %s1392_s0 = inlined_call_operand.hbm [shape: f32[8,256], index: 0, kind: input, shape index: {}]   ;;  %s1393_s1 = inlined_call_operand.vmem [shape: f32[8,4], index: 1, kind: input, shape index: {}]   ;;  %s1394_s2 = inlined_call_operand.hbm [shape: f32[10,2048], index: 2, kind: input, shape index: {}]   ;;  %s1395_s3 = inlined_call_operand.vmem [shape: f32[1,10], index: 3, kind: input, shape index: {}]   ;;  %s1396_s4 = inlined_call_operand.hbm [shape: f32[2,10], index: 4, kind: output, shape index: {}]  }
   0x1   :  { %10 = vsyncpa [#allocation6], 0 }
   0x2   :  { %11 = vsyncpa [#allocation9], 0 }
   0x3   :  { %12 = vsyncpa [#allocation5], 0  ;;  %s29_s17 = sshll.u32 %s1393_s1, 4  ;;  %s1132_s18 = smov [#allocation3]   ;;  %s30_s17 = int_to_ptr.vmem [resolvable:$true] %s29_s17 }
   0x4   :  { %s19_s19 = sshll.u32 %s1132_s18, 4  ;;  %s20_s19 = int_to_ptr.vmem [resolvable:$true] %s19_s19 }
   0x5   :  { %s1060_s20 = scalar_lea.vmem %s20_s19, 256  ;;  %p1065_p1 = scmp.lt.s32.totalorder %s20_s19, %s20_s19 }
   0x6   :  { %p1061_p0 = scmp.ne.s32.totalorder %s20_s19, %s1060_s20  ;;  %p1066_p2 = scmp.lt.s32.totalorder %s1060_s20, %s1060_s20 }
   0x8   :  { %p1067_p3 = por %p1066_p2, %p1065_p1 }
   0xa   :  { %p1068_p4 = pnand %p1067_p3, %p1061_p0 }
   0xc   :  { %1071 = shalt.err (!%p1068_p4)
}
   0xd   :  { %22 = dma.hbm_to_vmem [thread:$0]  %s1392_s0, 256, %s20_s19, [#allocation4]  }
   0xe   :  { %s1072_s23 = scalar_lea.vmem %s30_s17, 128  ;;  %p1077_p6 = scmp.lt.s32.totalorder %s30_s17, %s30_s17 }
   0xf   :  { %p1073_p5 = scmp.ne.s32.totalorder %s30_s17, %s1072_s23  ;;  %p1078_p7 = scmp.lt.s32.totalorder %s1072_s23, %s1072_s23 }
  0x11   :  { %p1079_p8 = por %p1078_p7, %p1077_p6 }
  0x13   :  { %p1080_p9 = pnand %p1079_p8, %p1073_p5 }
  0x15   :  { %1083 = shalt.err (!%p1080_p9)
}
  0x16   :  { %s1133_s1 = smov [#allocation7]   ;;  %s1134_s24 = smov [#allocation8]  }
  0x17   :  { %32 = dma.vmem_to_smem %s30_s17, 128, %s1133_s1, [#allocation6]  }
  0x18   :  { %s38_s25 = sshll.u32 %s1134_s24, 4  ;;  %s39_s25 = int_to_ptr.vmem [resolvable:$true] %s38_s25 }
  0x19   :  { %s1092_s26 = scalar_lea.vmem %s39_s25, 4096  ;;  %p1097_p11 = scmp.lt.s32.totalorder %s39_s25, %s39_s25 }
  0x1a   :  { %p1093_p10 = scmp.ne.s32.totalorder %s39_s25, %s1092_s26  ;;  %p1098_p12 = scmp.lt.s32.totalorder %s1092_s26, %s1092_s26 }
  0x1c   :  { %p1099_p13 = por %p1098_p12, %p1097_p11 }
  0x1e   :  { %p1100_p0 = pnand %p1099_p13, %p1093_p10 }
  0x20   :  { %1103 = shalt.err (!%p1100_p0)
}
  0x21   :  { %s1135_s0 = smov 2048   ;;  %s1136_s27 = smov 128  }
  0x22   :  { %44 = dma.hbm_to_vmem [thread:$0]  %s1394_s2, 4096, %s39_s25, [#allocation9], %s1135_s0, %s1135_s0, %s1136_s27  }
  0x23   :  { %1124 = dma.done.wait [#allocation4], 256  }
  0x24   :  { %1125 = vsyncadd [#allocation4], 4294967040 }
  0x25   :  { %1126 = dma.done.wait [#allocation6], 128  }
  0x26   :  { %1127 = vsyncadd [#allocation6], 4294967168 }
  0x27   :  { %1128 = dma.done.wait [#allocation9], 4096  }
  0x28   :  { %1129 = vsyncadd [#allocation9], 4294963200 }
  0x29   :  { %56 = sfence }
  0x2a   :  { %v320_v0 = vld [vmem:[#allocation8 + $0x88] sm:$0x3]  ;;  %v319_v1 = vld [vmem:[#allocation8 + $0x80] sm:$0x3]  ;;  %v322_v2 = vld [vmem:[#allocation8 + $0x98] sm:$0x3]  ;;  %v108_v10 = vlaneseq }
  0x2b   :  { %458 = vmatprep.subr.mxu0 %v320_v0  ;;  %528 = vmatprep.subr.mxu1 %v322_v2  ;;  %v321_v3 = vld [vmem:[#allocation8 + $0x90] sm:$0x3]  ;;  %v304_v4 = vld [vmem:[#allocation8 + $0x8] sm:$0xff]  ;;  %s57_s30 = sld [smem:[#allocation7]]  ;;  %v303_v5 = vld [vmem:[#allocation8] sm:$0xff]  ;;  %vm990_vm1 = vcmask 74752  }
  0x2c   :  { %459 = vmatpush1.xpose.msra.mxu0 %v319_v1  ;;  %529 = vmatpush1.xpose.msra.mxu1 %v321_v3  ;;  %v306_v6 = vld [vmem:[#allocation8 + $0x18] sm:$0xff]  ;;  %s1009_s2 = sld [smem:[#allocation7 + $0x1]]  ;;  %v305_v7 = vld [vmem:[#allocation8 + $0x10] sm:$0xff]  ;;  %vm1194_vm0 = vcmp.lt.s32.totalorder %v108_v10, 256  ;;  %v324_v28 = vld [vmem:[#allocation8 + $0xa8] sm:$0x3] }
  0x2d   :  { %460 = vmatprep.subr.mxu0 %v304_v4  ;;  %530 = vmatprep.subr.mxu1 %v306_v6  ;;  %s1010_s5 = sld [smem:[#allocation7 + $0x2]]  ;;  %v1173_v8 = vld [vmem:[#allocation3] ss:$8 sm:$0x3]  ;;  %v1137_v52 = vmov 1983009808  }
  0x2e   :  { %s1175_s6 = sld [smem:[#allocation7 + $0x3]]  ;;  %v1177_v9 = vld [vmem:[#allocation3 + $0x1] ss:$8 sm:$0x3]  ;;  %v348_v53 = vunpack.c.l.s4 %v1137_v52  ;;  %v351_v54 = vshrl.u32 %v108_v10, 7 }
  0x2f   :  { %s1179_s7 = sld [smem:[#allocation7 + $0x80]]  ;;  %v1181_v11 = vld [vmem:[#allocation3 + $0x2] ss:$8 sm:$0x3]  ;;  %v326_v33 = vld [vmem:[#allocation8 + $0xb8] sm:$0x3] }
  0x30   :  { %461 = vmatpush1.xpose.msra.mxu0 %v303_v5  ;;  %531 = vmatpush1.xpose.msra.mxu1 %v305_v7  ;;  %s1183_s8 = sld [smem:[#allocation7 + $0x81]]  ;;  %v1185_v12 = vld [vmem:[#allocation3 + $0x3] ss:$8 sm:$0x3]  ;;  %v349_v60 = vunpack.c.0.s8 %v348_v53 }
  0x31   :  { %s1187_s9 = sld [smem:[#allocation7 + $0x82]]  ;;  %v96_v13 = vstv %s57_s30  ;;  %v1189_v14 = vld [vmem:[#allocation3 + $0x4] ss:$8 sm:$0x3]  ;;  %598 = vmatprep.subr.mxu0 %v324_v28  ;;  %668 = vmatprep.subr.mxu1 %v326_v33 }
  0x32   :  { %s1191_s10 = sld [smem:[#allocation7 + $0x83]]  ;;  %v97_v15 = vmul.f32 %v96_v13, %v1173_v8  ;;  %v98_v16 = vstv %s1009_s2  ;;  %v1198_v18 = vld [vmem:[#allocation3 + $0x5] ss:$8 sm:$0x3]  ;;  %v219_v19 = vmul.f32 %v1189_v14, %v96_v13  ;;  %v1252_v4 = vsub.s32 %v349_v60, %v351_v54 }
  0x33   :  { %v99_v20 = vmul.f32 %v98_v16, %v1177_v9  ;;  %v101_v21 = vstv %s1010_s5  ;;  %v1202_v22 = vld [vmem:[#allocation3 + $0x6] ss:$8 sm:$0x3]  ;;  %v1204_v23 = vld [vmem:[#allocation3 + $0x7] ss:$8 sm:$0x3]  ;;  %v220_v24 = vmul.f32 %v1198_v18, %v98_v16 }
  0x34   :  { %v102_v25 = vmul.f32 %v101_v21, %v1181_v11  ;;  %v104_v26 = vstv %s1175_s6  ;;  %v222_v27 = vmul.f32 %v1202_v22, %v101_v21  ;;  %s1212_s11 = sld [smem:[#allocation7 + $0x100]] }
  0x35   :  { %v100_v29 = vadd.f32 %v99_v20, %v97_v15  ;;  %v105_v30 = vmul.f32 %v104_v26, %v1185_v12  ;;  %v113_v31 = vstv %s1179_s7  ;;  %v221_v32 = vadd.f32 %v220_v24, %v219_v19  ;;  %s1218_s12 = sld [smem:[#allocation7 + $0x101]] }
  0x36   :  { %v114_v34 = vmul.f32 %v113_v31, %v1173_v8  ;;  %v115_v35 = vstv %s1183_s8  ;;  %v224_v36 = vmul.f32 %v1204_v23, %v104_v26  ;;  %v229_v37 = vmul.f32 %v1189_v14, %v113_v31  ;;  %s1222_s13 = sld [smem:[#allocation7 + $0x102]]  ;;  %s1138_s8 = smov [#allocation10]  }
  0x37   :  { %v103_v38 = vadd.f32 %v102_v25, %v100_v29  ;;  %v116_v39 = vmul.f32 %v115_v35, %v1177_v9  ;;  %v118_v40 = vstv %s1187_s9  ;;  %v223_v41 = vadd.f32 %v222_v27, %v221_v32  ;;  %s1228_s14 = sld [smem:[#allocation7 + $0x103]]  ;;  %s998_s9 = sshll.u32 %s1138_s8, 4  ;;  %s999_s9 = int_to_ptr.vmem [resolvable:$true] %s998_s9 }
  0x38   :  { %v119_v42 = vmul.f32 %v118_v40, %v1181_v11  ;;  %v121_v43 = vstv %s1191_s10  ;;  %v230_v44 = vmul.f32 %v1198_v18, %v115_v35  ;;  %v232_v45 = vmul.f32 %v1202_v22, %v118_v40  ;;  %s1231_s15 = sld [smem:[#allocation7 + $0x180]]  ;;  %p1109_p2 = scmp.lt.s32.totalorder %s999_s9, %s999_s9 }
  0x39   :  { %v106_v46 = vadd.f32 %v105_v30, %v103_v38  ;;  %v117_v47 = vadd.f32 %v116_v39, %v114_v34  ;;  %v122_v48 = vmul.f32 %v121_v43, %v1185_v12  ;;  %v225_v49 = vadd.f32 %v224_v36, %v223_v41  ;;  %s1234_s16 = sld [smem:[#allocation7 + $0x181]] }
  0x3a   :  { %v231_v50 = vadd.f32 %v230_v44, %v229_v37  ;;  %v234_v51 = vmul.f32 %v1204_v23, %v121_v43  ;;  %s1236_s17 = sld [smem:[#allocation7 + $0x182]]  ;;  %v127_v58 = vstv %s1212_s11 }
  0x3b   :  { %v107_v55 = vmax.f32 %v106_v46, 0.0  ;;  %v120_v56 = vadd.f32 %v119_v42, %v117_v47  ;;  %v226_v57 = vmax.f32 %v225_v49, 0.0  ;;  %s1239_s18 = sld [smem:[#allocation7 + $0x183]]  ;;  %v128_v61 = vmul.f32 %v127_v58, %v1173_v8 }
  0x3c   :  { %v233_v59 = vadd.f32 %v232_v45, %v231_v50  ;;  %v129_v62 = vstv %s1218_s12  ;;  %v132_v1 = vstv %s1222_s13  ;;  %v239_v2 = vmul.f32 %v1189_v14, %v127_v58  ;;  %s1250_s19 = sld [smem:[#allocation7 + $0x200]] }
  0x3d   :  { %112 = vst.msk [vmem:[#allocation2] ss:$2 sm:$0x3] %vm1194_vm0, %v107_v55  ;;  %v123_v63 = vadd.f32 %v122_v48, %v120_v56  ;;  %228 = vst.msk [vmem:[#allocation2 + $0x1] ss:$2 sm:$0x3] %vm1194_vm0, %v226_v57  ;;  %v130_v0 = vmul.f32 %v129_v62, %v1177_v9  ;;  %v133_v5 = vmul.f32 %v132_v1, %v1181_v11  ;;  %v135_v6 = vstv %s1228_s14 }
  0x3e   :  { %v235_v3 = vadd.f32 %v234_v51, %v233_v59  ;;  %s1256_s20 = sld [smem:[#allocation7 + $0x201]]  ;;  %v136_v13 = vmul.f32 %v135_v6, %v1185_v12  ;;  %v141_v15 = vstv %s1231_s15  ;;  %v240_v21 = vmul.f32 %v1198_v18, %v129_v62 }
  0x3f   :  { %v124_v7 = vmax.f32 %v123_v63, 0.0  ;;  %v131_v10 = vadd.f32 %v130_v0, %v128_v61  ;;  %s1260_s21 = sld [smem:[#allocation7 + $0x202]]  ;;  %v142_v19 = vmul.f32 %v141_v15, %v1173_v8  ;;  %v143_v20 = vstv %s1234_s16 }
  0x40   :  { %v236_v16 = vmax.f32 %v235_v3, 0.0  ;;  %s1265_s22 = sld [smem:[#allocation7 + $0x203]]  ;;  %v144_v25 = vmul.f32 %v143_v20, %v1177_v9  ;;  %v146_v26 = vstv %s1236_s17  ;;  %v242_v27 = vmul.f32 %v1202_v22, %v132_v1 }
  0x41   :  { %126 = vst.msk [vmem:[#allocation2 + $0x4] ss:$2 sm:$0x3] %vm1194_vm0, %v124_v7  ;;  %v134_v24 = vadd.f32 %v133_v5, %v131_v10  ;;  %s1272_s23 = sld [smem:[#allocation7 + $0x280]]  ;;  %v147_v28 = vmul.f32 %v146_v26, %v1181_v11  ;;  %v149_v29 = vstv %s1239_s18  ;;  %v241_v30 = vadd.f32 %v240_v21, %v239_v2 }
  0x42   :  { %238 = vst.msk [vmem:[#allocation2 + $0x5] ss:$2 sm:$0x3] %vm1194_vm0, %v236_v16  ;;  %v244_v31 = vmul.f32 %v1204_v23, %v135_v6  ;;  %s1279_s1 = sld [smem:[#allocation7 + $0x281]]  ;;  %v145_v33 = vadd.f32 %v144_v25, %v142_v19  ;;  %v150_v34 = vmul.f32 %v149_v29, %v1185_v12  ;;  %v249_v35 = vmul.f32 %v1189_v14, %v141_v15  ;;  %v323_v15 = vld [vmem:[#allocation8 + $0xa0] sm:$0x3] }
  0x43   :  { %v137_v32 = vadd.f32 %v136_v13, %v134_v24  ;;  %s1283_s24 = sld [smem:[#allocation7 + $0x282]]  ;;  %v243_v36 = vadd.f32 %v242_v27, %v241_v30  ;;  %v250_v37 = vmul.f32 %v1198_v18, %v143_v20  ;;  %v252_v38 = vmul.f32 %v1202_v22, %v146_v26  ;;  %v308_v25 = vld [vmem:[#allocation8 + $0x28] sm:$0xff] }
  0x44   :  { %v254_v39 = vmul.f32 %v1204_v23, %v149_v29  ;;  %s1288_s25 = sld [smem:[#allocation7 + $0x283]]  ;;  %v148_v41 = vadd.f32 %v147_v28, %v145_v33  ;;  %v155_v42 = vstv %s1250_s19  ;;  %v157_v43 = vstv %s1256_s20  ;;  %v325_v29 = vld [vmem:[#allocation8 + $0xb0] sm:$0x3] }
  0x45   :  { %v138_v40 = vmax.f32 %v137_v32, 0.0  ;;  %v245_v44 = vadd.f32 %v244_v31, %v243_v36  ;;  %v251_v45 = vadd.f32 %v250_v37, %v249_v35  ;;  %v156_v46 = vmul.f32 %v155_v42, %v1173_v8  ;;  %s1294_s26 = sld [smem:[#allocation7 + $0x300]] }
  0x46   :  { %v158_v47 = vmul.f32 %v157_v43, %v1177_v9  ;;  %v151_v48 = vadd.f32 %v150_v34, %v148_v41  ;;  %v160_v49 = vstv %s1260_s21  ;;  %v163_v50 = vstv %s1265_s22  ;;  %s1301_s0 = sld [smem:[#allocation7 + $0x301]]  ;;  %v310_v34 = vld [vmem:[#allocation8 + $0x38] sm:$0xff] }
  0x47   :  { %140 = vst.msk [vmem:[#allocation2 + $0x8] ss:$2 sm:$0x3] %vm1194_vm0, %v138_v40  ;;  %v169_v51 = vstv %s1272_s23  ;;  %v246_v52 = vmax.f32 %v245_v44, 0.0  ;;  %v253_v53 = vadd.f32 %v252_v38, %v251_v45  ;;  %v161_v55 = vmul.f32 %v160_v49, %v1181_v11  ;;  %s1304_s27 = sld [smem:[#allocation7 + $0x302]] }
  0x48   :  { %v159_v54 = vadd.f32 %v158_v47, %v156_v46  ;;  %v152_v57 = vmax.f32 %v151_v48, 0.0  ;;  %v164_v58 = vmul.f32 %v163_v50, %v1185_v12  ;;  %v170_v59 = vmul.f32 %v169_v51, %v1173_v8  ;;  %s1309_s28 = sld [smem:[#allocation7 + $0x303]]  ;;  %v328_v44 = vld [vmem:[#allocation8 + $0xc8] sm:$0x3] }
  0x49   :  { %v299_v56 = vld [vmem:[#allocation2] sm:$0xff]  ;;  %v171_v60 = vstv %s1279_s1  ;;  %248 = vst.msk [vmem:[#allocation2 + $0x9] ss:$2 sm:$0x3] %vm1194_vm0, %v246_v52  ;;  %v255_v63 = vadd.f32 %v254_v39, %v253_v53  ;;  %s1314_s29 = sld [smem:[#allocation7 + $0x380]]  ;;  %v174_v2 = vstv %s1283_s24  ;;  %v259_v5 = vmul.f32 %v1189_v14, %v155_v42  ;;  %v307_v39 = vld [vmem:[#allocation8 + $0x20] sm:$0xff] }
  0x4a   :  { %v353_v61 = vrot.slane %v299_v56, %v1252_v4  ;;  %v346_v62 = vcombine.high %v299_v56, %v299_v56  ;;  %v162_v0 = vadd.f32 %v161_v55, %v159_v54  ;;  %154 = vst.msk [vmem:[#allocation2 + $0xc] ss:$2 sm:$0x3] %vm1194_vm0, %v152_v57  ;;  %v172_v1 = vmul.f32 %v171_v60, %v1177_v9  ;;  %s1322_s30 = sld [smem:[#allocation7 + $0x381]]  ;;  %v330_v54 = vld [vmem:[#allocation8 + $0xd8] sm:$0x3] }
  0x4b   :  { %v177_v3 = vstv %s1288_s25  ;;  %v256_v10 = vmax.f32 %v255_v63, 0.0  ;;  %s1325_s2 = sld [smem:[#allocation7 + $0x382]]  ;;  %v175_v19 = vmul.f32 %v174_v2, %v1181_v11  ;;  %v260_v21 = vmul.f32 %v1198_v18, %v157_v43 }
  0x4c   :  { %v361_v6 = vcombine.high %v353_v61, %v353_v61  ;;  %v360_v7 = vrot.slane %v346_v62, %v1252_v4  ;;  %v165_v13 = vadd.f32 %v164_v58, %v162_v0  ;;  %v173_v16 = vadd.f32 %v172_v1, %v170_v59  ;;  %s1336_s5 = sld [smem:[#allocation7 + $0x383]] }
  0x4d   :  { %v178_v20 = vmul.f32 %v177_v3, %v1185_v12  ;;  %258 = vst.msk [vmem:[#allocation2 + $0xd] ss:$2 sm:$0x3] %vm1194_vm0, %v256_v10  ;;  %v262_v27 = vmul.f32 %v1202_v22, %v160_v49  ;;  %v264_v28 = vmul.f32 %v1204_v23, %v163_v50  ;;  %v261_v31 = vadd.f32 %v260_v21, %v259_v5  ;;  %v309_v49 = vld [vmem:[#allocation8 + $0x30] sm:$0xff] }
  0x4e   :  { %494 = vmatprep.mubr.f32.mxu0 %v361_v6  ;;  %v362_v24 = vcombine.high %v360_v7, %v360_v7  ;;  %v166_v26 = vmax.f32 %v165_v13, 0.0  ;;  %v176_v30 = vadd.f32 %v175_v19, %v173_v16  ;;  %v269_v32 = vmul.f32 %v1189_v14, %v169_v51  ;;  %v327_v16 = vld [vmem:[#allocation8 + $0xc0] sm:$0x3] }
  0x4f   :  { %495 = vmatmul.mubr.f32.vlgmr.msra.gmra.mxu0 %v353_v61  ;;  %v270_v33 = vmul.f32 %v1198_v18, %v171_v60  ;;  %v272_v35 = vmul.f32 %v1202_v22, %v174_v2  ;;  %v274_v36 = vmul.f32 %v1204_v23, %v177_v3  ;;  %v183_v37 = vstv %s1294_s26 }
  0x50   :  { %599 = vmatpush1.xpose.msra.mxu0 %v323_v15  ;;  %564 = vmatprep.mubr.f32.mxu1 %v362_v24  ;;  %168 = vst.msk [vmem:[#allocation2 + $0x10] ss:$2 sm:$0x3] %vm1194_vm0, %v166_v26  ;;  %v185_v38 = vstv %s1301_s0  ;;  %v179_v40 = vadd.f32 %v178_v20, %v176_v30  ;;  %v263_v41 = vadd.f32 %v262_v27, %v261_v31  ;;  %v188_v43 = vstv %s1304_s27  ;;  %v312_v24 = vld [vmem:[#allocation8 + $0x48] sm:$0xff] }
  0x51   :  { %565 = vmatmul.mubr.f32.vlgmr.msra.gmra.mxu1 %v360_v7  ;;  %600 = vmatprep.subr.mxu0 %v308_v25  ;;  %v271_v42 = vadd.f32 %v270_v33, %v269_v32  ;;  %v184_v45 = vmul.f32 %v183_v37, %v1173_v8  ;;  %v186_v46 = vmul.f32 %v185_v38, %v1177_v9  ;;  %v191_v48 = vstv %s1309_s28  ;;  %v314_v32 = vld [vmem:[#allocation8 + $0x58] sm:$0xff] }
  0x52   :  { %669 = vmatpush1.xpose.msra.mxu1 %v325_v29  ;;  %v189_v47 = vmul.f32 %v188_v43, %v1181_v11  ;;  %v180_v50 = vmax.f32 %v179_v40, 0.0  ;;  %v265_v51 = vadd.f32 %v264_v28, %v263_v41  ;;  %v192_v53 = vmul.f32 %v191_v48, %v1185_v12  ;;  %v329_v28 = vld [vmem:[#allocation8 + $0xd0] sm:$0x3]  ;;  %v334_v40 = vld [vmem:[#allocation8 + $0xf8] sm:$0x3] }
  0x53   :  { %670 = vmatprep.subr.mxu1 %v310_v34  ;;  %v273_v52 = vadd.f32 %v272_v35, %v271_v42  ;;  %v187_v55 = vadd.f32 %v186_v46, %v184_v45  ;;  %v197_v56 = vstv %s1314_s29  ;;  %v199_v57 = vstv %s1322_s30 }
  0x54   :  { %601 = vmatpush1.xpose.msra.mxu0 %v307_v39  ;;  %v202_v58 = vstv %s1325_s2  ;;  %v300_v59 = vld [vmem:[#allocation2 + $0x8] sm:$0xff]  ;;  %182 = vst.msk [vmem:[#allocation2 + $0x14] ss:$2 sm:$0x3] %vm1194_vm0, %v180_v50  ;;  %v266_v60 = vmax.f32 %v265_v51, 0.0  ;;  %v198_v62 = vmul.f32 %v197_v56, %v1173_v8  ;;  %v200_v63 = vmul.f32 %v199_v57, %v1177_v9 }
  0x55   :  { %738 = vmatprep.subr.mxu0 %v328_v44  ;;  %v275_v61 = vadd.f32 %v274_v36, %v273_v52  ;;  %v370_v0 = vrot.slane %v300_v59, %v1252_v4  ;;  %v363_v1 = vcombine.high %v300_v59, %v300_v59  ;;  %v190_v2 = vadd.f32 %v189_v47, %v187_v55  ;;  %v332_v36 = vld [vmem:[#allocation8 + $0xe8] sm:$0x3]  ;;  %v331_v47 = vld [vmem:[#allocation8 + $0xe0] sm:$0x3]  ;;  %v333_v50 = vld [vmem:[#allocation8 + $0xf0] sm:$0x3] }
  0x56   :  { %671 = vmatpush1.xpose.msra.mxu1 %v309_v49  ;;  %v203_v3 = vmul.f32 %v202_v58, %v1181_v11  ;;  %268 = vst.msk [vmem:[#allocation2 + $0x11] ss:$2 sm:$0x3] %vm1194_vm0, %v266_v60  ;;  %v201_v6 = vadd.f32 %v200_v63, %v198_v62  ;;  %v205_v7 = vstv %s1336_s5  ;;  %v279_v10 = vmul.f32 %v1189_v14, %v183_v37  ;;  %v316_v49 = vld [vmem:[#allocation8 + $0x68] sm:$0xff]  ;;  %v318_v51 = vld [vmem:[#allocation8 + $0x78] sm:$0xff]  ;;  %v315_v52 = vld [vmem:[#allocation8 + $0x60] sm:$0xff] }
  0x57   :  { %808 = vmatprep.subr.mxu1 %v330_v54  ;;  %v276_v5 = vmax.f32 %v275_v61, 0.0  ;;  %v378_v13 = vcombine.high %v370_v0, %v370_v0  ;;  %v377_v8 = vrot.slane %v363_v1, %v1252_v4  ;;  %v193_v9 = vadd.f32 %v192_v53, %v190_v2  ;;  %v317_v53 = vld [vmem:[#allocation8 + $0x70] sm:$0xff] }
  0x58   :  { %v206_v15 = vmul.f32 %v205_v7, %v1185_v12  ;;  %v204_v11 = vadd.f32 %v203_v3, %v201_v6  ;;  %v280_v19 = vmul.f32 %v1198_v18, %v185_v38  ;;  %v282_v20 = vmul.f32 %v1202_v22, %v188_v43  ;;  %v313_v38 = vld [vmem:[#allocation8 + $0x50] sm:$0xff] }
  0x59   :  { %278 = vst.msk [vmem:[#allocation2 + $0x15] ss:$2 sm:$0x3] %vm1194_vm0, %v276_v5  ;;  %634 = vmatprep.mubr.f32.mxu0 %v378_v13  ;;  %v379_v21 = vcombine.high %v377_v8, %v377_v8  ;;  %v194_v25 = vmax.f32 %v193_v9, 0.0  ;;  %v289_v26 = vmul.f32 %v1189_v14, %v197_v56  ;;  %v290_v27 = vmul.f32 %v1198_v18, %v199_v57  ;;  %v311_v14 = vld [vmem:[#allocation8 + $0x40] sm:$0xff] }
  0x5a   :  { %635 = vmatmul.mubr.f32.vlgmr.msra.gmra.mxu0 %v370_v0  ;;  %v207_v12 = vadd.f32 %v206_v15, %v204_v11  ;;  %v281_v29 = vadd.f32 %v280_v19, %v279_v10  ;;  %v284_v30 = vmul.f32 %v1204_v23, %v191_v48  ;;  %v292_v31 = vmul.f32 %v1202_v22, %v202_v58  ;;  %v1040_v0 = vld [vmem:[%s1395_s3] ss:$0 sm:$0xff]  ;;  %s1104_s3 = scalar_lea.vmem %s999_s9, 32 }
  0x5b   :  { %704 = vmatprep.mubr.f32.mxu1 %v379_v21  ;;  %739 = vmatpush1.xpose.msra.mxu0 %v327_v16  ;;  %196 = vst.msk [vmem:[#allocation2 + $0x18] ss:$2 sm:$0x3] %vm1194_vm0, %v194_v25  ;;  %v291_v33 = vadd.f32 %v290_v27, %v289_v26  ;;  %v294_v34 = vmul.f32 %v1204_v23, %v205_v7  ;;  %p1105_p1 = scmp.ne.s32.totalorder %s999_s9, %s1104_s3  ;;  %p1110_p3 = scmp.lt.s32.totalorder %s1104_s3, %s1104_s3 }
  0x5c   :  { %705 = vmatmul.mubr.f32.vlgmr.msra.gmra.mxu1 %v377_v8  ;;  %740 = vmatprep.subr.mxu0 %v312_v24  ;;  %v208_v18 = vmax.f32 %v207_v12, 0.0  ;;  %v283_v35 = vadd.f32 %v282_v20, %v281_v29 }
  0x5d   :  { %809 = vmatpush1.xpose.msra.mxu1 %v329_v28  ;;  %v293_v37 = vadd.f32 %v292_v31, %v291_v33  ;;  %p1111_p4 = por %p1110_p3, %p1109_p2 }
  0x5e   :  { %810 = vmatprep.subr.mxu1 %v314_v32  ;;  %210 = vst.msk [vmem:[#allocation2 + $0x1c] ss:$2 sm:$0x3] %vm1194_vm0, %v208_v18  ;;  %v285_v22 = vadd.f32 %v284_v30, %v283_v35 }
  0x5f   :  { %741 = vmatpush1.xpose.msra.mxu0 %v311_v14  ;;  %v295_v41 = vadd.f32 %v294_v34, %v293_v37  ;;  %p1112_p5 = pnand %p1111_p4, %p1105_p1 }
  0x60   :  { %v301_v39 = vld [vmem:[#allocation2 + $0x10] sm:$0xff]  ;;  %878 = vmatprep.subr.mxu0 %v332_v36  ;;  %v286_v43 = vmax.f32 %v285_v22, 0.0 }
  0x61   :  { %v387_v23 = vrot.slane %v301_v39, %v1252_v4  ;;  %v380_v42 = vcombine.high %v301_v39, %v301_v39  ;;  %811 = vmatpush1.xpose.msra.mxu1 %v313_v38  ;;  %v296_v44 = vmax.f32 %v295_v41, 0.0 }
  0x62   :  { %948 = vmatprep.subr.mxu1 %v334_v40  ;;  %288 = vst.msk [vmem:[#allocation2 + $0x19] ss:$2 sm:$0x3] %vm1194_vm0, %v286_v43 }
  0x63   :  { %v395_v45 = vcombine.high %v387_v23, %v387_v23  ;;  %v394_v46 = vrot.slane %v380_v42, %v1252_v4  ;;  %298 = vst.msk [vmem:[#allocation2 + $0x1d] ss:$2 sm:$0x3] %vm1194_vm0, %v296_v44 }
  0x65   :  { %774 = vmatprep.mubr.f32.mxu0 %v395_v45  ;;  %v396_v48 = vcombine.high %v394_v46, %v394_v46 }
  0x66   :  { %775 = vmatmul.mubr.f32.vlgmr.msra.gmra.mxu0 %v387_v23 }
  0x67   :  { %844 = vmatprep.mubr.f32.mxu1 %v396_v48  ;;  %879 = vmatpush1.xpose.msra.mxu0 %v331_v47 }
  0x68   :  { %845 = vmatmul.mubr.f32.vlgmr.msra.gmra.mxu1 %v394_v46  ;;  %880 = vmatprep.subr.mxu0 %v316_v49 }
  0x69   :  { %949 = vmatpush1.xpose.msra.mxu1 %v333_v50 }
  0x6a   :  { %950 = vmatprep.subr.mxu1 %v318_v51  ;;  %v302_v54 = vld [vmem:[#allocation2 + $0x18] sm:$0xff] }
  0x6b   :  { %881 = vmatpush1.xpose.msra.mxu0 %v315_v52  ;;  %v404_v55 = vrot.slane %v302_v54, %v1252_v4  ;;  %v397_v17 = vcombine.high %v302_v54, %v302_v54 }
  0x6d   :  { %951 = vmatpush1.xpose.msra.mxu1 %v317_v53  ;;  %v412_v56 = vcombine.high %v404_v55, %v404_v55  ;;  %v411_v57 = vrot.slane %v397_v17, %v1252_v4 }
  0x6f   :  { %914 = vmatprep.mubr.f32.mxu0 %v412_v56  ;;  %v413_v58 = vcombine.high %v411_v57, %v411_v57 }
  0x70   :  { %915 = vmatmul.mubr.f32.vlgmr.msra.gmra.mxu0 %v404_v55 }
  0x71   :  { %984 = vmatprep.mubr.f32.mxu1 %v413_v58 }
  0x72   :  { %985 = vmatmul.mubr.f32.vlgmr.msra.gmra.mxu1 %v411_v57 }
 0x10f   :  { %v496_v59 = vpop.f32.mrf.mxu0 }
 0x110   :  { %v497_v5 = vadd.f32 %v1040_v0, %v496_v59 }
 0x111   :  { %v498_v60 = vpop.f32.mrf.mxu0  ;;  %v566_v61 = vpop.f32.mrf.mxu1 }
 0x112   :  { %v567_v6 = vadd.f32 %v566_v61, %v497_v5 }
 0x113   :  { %v568_v62 = vpop.f32.mrf.mxu1 }
 0x11a   :  { %v636_v63 = vpop.f32.mrf.mxu0 }
 0x11b   :  { %v637_v4 = vadd.f32 %v636_v63, %v567_v6 }
 0x11c   :  { %v638_v1 = vpop.f32.mrf.mxu0  ;;  %v706_v2 = vpop.f32.mrf.mxu1 }
 0x11d   :  { %v707_v8 = vadd.f32 %v706_v2, %v637_v4 }
 0x11e   :  { %v708_v3 = vpop.f32.mrf.mxu1 }
 0x126   :  { %v776_v7 = vpop.f32.mrf.mxu0 }
 0x127   :  { %v777_v15 = vadd.f32 %v776_v7, %v707_v8 }
 0x128   :  { %v778_v10 = vpop.f32.mrf.mxu0  ;;  %v846_v13 = vpop.f32.mrf.mxu1 }
 0x129   :  { %v847_v16 = vadd.f32 %v846_v13, %v777_v15 }
 0x12a   :  { %v848_v9 = vpop.f32.mrf.mxu1 }
 0x130   :  { %v916_v11 = vpop.f32.mrf.mxu0 }
 0x131   :  { %v917_v19 = vadd.f32 %v916_v11, %v847_v16 }
 0x132   :  { %v918_v20 = vpop.f32.mrf.mxu0  ;;  %v986_v21 = vpop.f32.mrf.mxu1 }
 0x133   :  { %v987_v24 = vadd.f32 %v986_v21, %v917_v19 }
 0x134   :  { %v988_v25 = vpop.f32.mrf.mxu1 }
 0x135   :  { %991 = vst.msk [vmem:[#allocation10] sm:$0x3] %vm990_vm1, %v987_v24 }
 0x136   :  { %1115 = shalt.err (!%p1112_p5)
}
 0x137   :  { %1001 = dma.vmem_to_hbm [thread:$0]  %s999_s9, 32, %s1396_s4, [#allocation5]  }
 0x138   :  { %1130 = dma.done.wait [#allocation5], 32  }
 0x139   :  { %1131 = vsyncadd [#allocation5], 4294967264 }
 0x13a   :  { %1005 = vsyncpa [#allocation4], 1 }
 0x13b   :  { %1006 = vsyncpa [#allocation9], 1 }
 0x13c   :  { %1007 = vsyncpa [#allocation5], 1 }
 0x13d   :  { %1008 = vsyncpa [#allocation6], 1 }

</bundles_post_ra>
